<compile_context>
chip_gen: v7x
topology: tpu7x:2x2x1
jax: 0.10.0
libtpu: 0.0.40
codegen_flags: <defaults>
</compile_context>

<pallas_src>
import functools

import jax
import jax.numpy as jnp
import numpy as np
from jax.experimental import pallas as pl
from jax.experimental.pallas import tpu as pltpu


def _round_up(n: int, m: int) -> int:
    return (n + m - 1) // m * m


def _mlp_dropout_kernel(seed_ref, x_ref, w1_ref, b1_ref, w2_ref, b2_ref, o_ref,
                        *, p_dropout: float, tb: int):
    # ---- fc1: [TB, In] (bf16) @ [In, H] (bf16) -> f32 accumulate on the MXU ----
    h = jnp.dot(x_ref[...].astype(jnp.bfloat16), w1_ref[...],
                preferred_element_type=jnp.float32)
    h = h + b1_ref[...]            # bias in f32
    h = jnp.maximum(h, 0.0)        # ReLU

    # ---- Dropout (inverted, training mode) ----
    if p_dropout > 0.0:
        # Portable counter-based hash PRNG (murmur-style finalizer). Uses only
        # vector ops so it lowers on TPU *and* in interpret mode (pltpu.prng_*
        # has no CPU lowering). Counter = global element index, so the mask is
        # independent of the batch tiling and unique per grid step.
        rows = jax.lax.broadcasted_iota(jnp.int32, h.shape, 0).astype(jnp.uint32)
        cols = jax.lax.broadcasted_iota(jnp.int32, h.shape, 1).astype(jnp.uint32)
        tile = pl.program_id(0).astype(jnp.uint32)
        global_row = rows + jnp.uint32(tb) * tile
        ctr = global_row * jnp.uint32(h.shape[1]) + cols

        s = seed_ref[0].astype(jnp.uint32)
        z = ctr ^ (s * jnp.uint32(0x9E3779B9))
        z = (z ^ (z >> 16)) * jnp.uint32(0x7FEB352D)
        z = (z ^ (z >> 15)) * jnp.uint32(0x846CA68B)
        bits = z ^ (z >> 16)

        # keep iff uniform_u32 >= round(p * 2^32)  =>  P(keep) = 1 - p exactly.
        threshold = jnp.uint32(min(int(round(p_dropout * 4294967296.0)),
                                   4294967295))
        keep = bits >= threshold
        scale = jnp.float32(1.0 / (1.0 - p_dropout))
        h = jnp.where(keep, h, 0.0) * scale

    # ---- fc2: [TB, H] (bf16) @ [H, Out] (bf16) -> f32 accumulate ----
    out = jnp.dot(h.astype(jnp.bfloat16), w2_ref[...],
                  preferred_element_type=jnp.float32)
    o_ref[...] = (out + b2_ref[...]).astype(o_ref.dtype)


def net_param_forward(x, w1, b1, w2, b2, seed, p_dropout, *, tb=256):
    """x: [B, n_input] f32; w1: [n_input, n_hidden]; w2: [n_hidden, n_output].

    Weights are stored pre-transposed ([in, out]) vs. PyTorch's [out, in].
    Returns [B, n_output] f32.
    """
    B, n_in = x.shape
    n_hid = w1.shape[1]
    n_out = w2.shape[1]

    # Lane-pad feature dims to 128; pad batch to a multiple of the batch tile.
    n_in_p = _round_up(n_in, 128)
    n_hid_p = _round_up(n_hid, 128)
    n_out_p = _round_up(n_out, 128)
    tb = min(tb, _round_up(B, 8))          # batch tile (multiple of 8 sublanes)
    B_p = _round_up(B, tb)

    x_p = jnp.zeros((B_p, n_in_p), jnp.float32).at[:B, :n_in].set(x)
    w1_p = jnp.zeros((n_in_p, n_hid_p), jnp.bfloat16).at[:n_in, :n_hid].set(
        w1.astype(jnp.bfloat16))
    b1_p = jnp.zeros((1, n_hid_p), jnp.float32).at[:, :n_hid].set(b1)
    w2_p = jnp.zeros((n_hid_p, n_out_p), jnp.bfloat16).at[:n_hid, :n_out].set(
        w2.astype(jnp.bfloat16))
    b2_p = jnp.zeros((1, n_out_p), jnp.float32).at[:, :n_out].set(b2)

    grid = (B_p // tb,)
    kernel = functools.partial(_mlp_dropout_kernel,
                               p_dropout=float(p_dropout), tb=tb)

    flops = 2 * B_p * (n_in_p * n_hid_p + n_hid_p * n_out_p)
    bytes_accessed = (B_p * n_in_p * 4 + n_in_p * n_hid_p * 2 + n_hid_p * 4 +
                      n_hid_p * n_out_p * 2 + n_out_p * 4 + B_p * n_out_p * 4)

    # NOTE: on v7x one could additionally single-buffer the weight blocks
    # (pipeline_mode=pl.Buffered(1)) to halve their VMEM footprint.
    out_p = pl.pallas_call(
        kernel,
        out_shape=jax.ShapeDtypeStruct((B_p, n_out_p), jnp.float32),
        grid_spec=pltpu.PrefetchScalarGridSpec(
            num_scalar_prefetch=1,                 # seed -> SMEM
            grid=grid,
            in_specs=[
                pl.BlockSpec((tb, n_in_p), lambda i, seed: (i, 0)),      # x tile
                pl.BlockSpec((n_in_p, n_hid_p), lambda i, seed: (0, 0)),  # w1 (resident)
                pl.BlockSpec((1, n_hid_p), lambda i, seed: (0, 0)),       # b1
                pl.BlockSpec((n_hid_p, n_out_p), lambda i, seed: (0, 0)),  # w2 (resident)
                pl.BlockSpec((1, n_out_p), lambda i, seed: (0, 0)),       # b2
            ],
            out_specs=pl.BlockSpec((tb, n_out_p), lambda i, seed: (i, 0)),
        ),
        compiler_params=pltpu.CompilerParams(
            dimension_semantics=("parallel",)),
        cost_estimate=pl.CostEstimate(flops=flops, transcendentals=0,
                                      bytes_accessed=bytes_accessed),
    )(seed, x_p, w1_p, b1_p, w2_p, b2_p)

    return out_p[:B, :n_out]


def init_linear_params(key, in_features, out_features):
    """Deterministic init mimicking torch.nn.Linear (U(-1/sqrt(fan_in), +1/sqrt(fan_in)))."""
    kw, kb = jax.random.split(key)
    bound = 1.0 / np.sqrt(in_features)
    # Stored as [in, out] (transposed vs. PyTorch's [out, in]) for row-major matmul.
    w = jax.random.uniform(kw, (in_features, out_features), jnp.float32,
                           minval=-bound, maxval=bound)
    b = jax.random.uniform(kb, (1, out_features), jnp.float32,
                           minval=-bound, maxval=bound)
    return w, b


if __name__ == "__main__":
    # Small shapes consistent with the module's forward: x is [batch, n_input].
    batch, n_input, n_hidden, n_output = 8, 32, 64, 16
    p_dropout = 0.5

    key = jax.random.PRNGKey(0)
    kx, k1, k2 = jax.random.split(key, 3)

    x = jax.random.normal(kx, (batch, n_input), jnp.float32)
    w1, b1 = init_linear_params(k1, n_input, n_hidden)
    w2, b2 = init_linear_params(k2, n_hidden, n_output)
    seed = jnp.array([1234], dtype=jnp.int32)

    out = net_param_forward(x, w1, b1, w2, b2, seed, p_dropout)
    out = jax.block_until_ready(out)

    assert out.shape == (batch, n_output)
    assert out.dtype == jnp.float32
    assert bool(jnp.all(jnp.isfinite(out)))
    print("KERNEL_OK")
</pallas_src>

<mosaic_0001>
module attributes {stable_mosaic.version = 11 : i64} {
  func.func @_mlp_dropout_kernel(%arg0: i32, %arg1: memref<1xi32, #tpu.memory_space<smem>>, %arg2: memref<8x128xf32, #tpu.memory_space<vmem>>, %arg3: memref<128x128xbf16, #tpu.memory_space<vmem>>, %arg4: memref<1x128xf32, #tpu.memory_space<vmem>>, %arg5: memref<128x128xbf16, #tpu.memory_space<vmem>>, %arg6: memref<1x128xf32, #tpu.memory_space<vmem>>, %arg7: memref<8x128xf32, #tpu.memory_space<vmem>>) attributes {dimension_semantics = [#tpu.dimension_semantics<parallel>], iteration_bounds = array<i64: 1>, scalar_prefetch = 1 : i64, scratch_operands = 0 : i64, tpu.core_type = #tpu.core_type<tc>, window_params = [{transform_indices = @transform_0, window_bounds = array<i64: 8, 128>}, {pipeline_mode = #tpu.pipeline_mode<synchronous>, transform_indices = @transform_1, window_bounds = array<i64: 128, 128>}, {pipeline_mode = #tpu.pipeline_mode<synchronous>, transform_indices = @transform_2, window_bounds = array<i64: 1, 128>}, {pipeline_mode = #tpu.pipeline_mode<synchronous>, transform_indices = @transform_3, window_bounds = array<i64: 128, 128>}, {pipeline_mode = #tpu.pipeline_mode<synchronous>, transform_indices = @transform_4, window_bounds = array<i64: 1, 128>}, {transform_indices = @transform_5, window_bounds = array<i64: 8, 128>}]} {
    %c0 = arith.constant 0 : index
    %c0_0 = arith.constant 0 : index
    %0 = vector.load %arg2[%c0, %c0_0] : memref<8x128xf32, #tpu.memory_space<vmem>>, vector<8x128xf32>
    %1 = arith.truncf %0 : vector<8x128xf32> to vector<8x128xbf16>
    %c0_1 = arith.constant 0 : index
    %c0_2 = arith.constant 0 : index
    %2 = vector.load %arg3[%c0_1, %c0_2] : memref<128x128xbf16, #tpu.memory_space<vmem>>, vector<128x128xbf16>
    %cst = arith.constant dense<0.000000e+00> : vector<8x128xf32>
    %3 = tpu.matmul %1, %2, %cst {dimension_numbers = #tpu.dot_dimension_numbers<[1], [0], [0], [1], [0, 0, 1, 1], [], []>} : vector<8x128xbf16>, vector<128x128xbf16>, vector<8x128xf32> -> vector<8x128xf32>
    %c0_3 = arith.constant 0 : index
    %c0_4 = arith.constant 0 : index
    %4 = vector.load %arg4[%c0_3, %c0_4] : memref<1x128xf32, #tpu.memory_space<vmem>>, vector<1x128xf32>
    %5 = vector.broadcast %4 : vector<1x128xf32> to vector<8x128xf32>
    %6 = arith.addf %3, %5 : vector<8x128xf32>
    %cst_5 = arith.constant 0.000000e+00 : f32
    %7 = vector.broadcast %cst_5 : f32 to vector<8x128xf32>
    %8 = arith.maximumf %6, %7 : vector<8x128xf32>
    %9 = tpu.iota {dimensions = array<i32: 0>} : vector<8x128xi32>
    %10 = tpu.iota {dimensions = array<i32: 1>} : vector<8x128xi32>
    %c8_i32 = arith.constant 8 : i32
    %11 = arith.muli %c8_i32, %arg0 : i32
    %12 = vector.broadcast %11 : i32 to vector<8x128xi32>
    %13 = arith.addi %9, %12 : vector<8x128xi32>
    %c128_i32 = arith.constant 128 : i32
    %14 = vector.broadcast %c128_i32 : i32 to vector<8x128xi32>
    %15 = arith.muli %13, %14 : vector<8x128xi32>
    %16 = arith.addi %15, %10 : vector<8x128xi32>
    %c0_6 = arith.constant 0 : index
    %17 = memref.load %arg1[%c0_6] : memref<1xi32, #tpu.memory_space<smem>>
    %c-1640531527_i32 = arith.constant -1640531527 : i32
    %18 = arith.muli %17, %c-1640531527_i32 : i32
    %19 = vector.broadcast %18 : i32 to vector<8x128xi32>
    %20 = arith.xori %16, %19 : vector<8x128xi32>
    %c16_i32 = arith.constant 16 : i32
    %21 = vector.broadcast %c16_i32 : i32 to vector<8x128xi32>
    %22 = arith.shrui %20, %21 : vector<8x128xi32>
    %23 = arith.xori %20, %22 : vector<8x128xi32>
    %c2146121005_i32 = arith.constant 2146121005 : i32
    %24 = vector.broadcast %c2146121005_i32 : i32 to vector<8x128xi32>
    %25 = arith.muli %23, %24 : vector<8x128xi32>
    %c15_i32 = arith.constant 15 : i32
    %26 = vector.broadcast %c15_i32 : i32 to vector<8x128xi32>
    %27 = arith.shrui %25, %26 : vector<8x128xi32>
    %28 = arith.xori %25, %27 : vector<8x128xi32>
    %c-2073254261_i32 = arith.constant -2073254261 : i32
    %29 = vector.broadcast %c-2073254261_i32 : i32 to vector<8x128xi32>
    %30 = arith.muli %28, %29 : vector<8x128xi32>
    %c16_i32_7 = arith.constant 16 : i32
    %31 = vector.broadcast %c16_i32_7 : i32 to vector<8x128xi32>
    %32 = arith.shrui %30, %31 : vector<8x128xi32>
    %33 = arith.xori %30, %32 : vector<8x128xi32>
    %c-2147483648_i32 = arith.constant -2147483648 : i32
    %34 = vector.broadcast %c-2147483648_i32 : i32 to vector<8x128xi32>
    %35 = arith.cmpi uge, %33, %34 : vector<8x128xi32>
    %cst_8 = arith.constant 0.000000e+00 : f32
    %36 = vector.broadcast %cst_8 : f32 to vector<8x128xf32>
    %37 = arith.select %35, %8, %36 : vector<8x128xi1>, vector<8x128xf32>
    %cst_9 = arith.constant 2.000000e+00 : f32
    %38 = vector.broadcast %cst_9 : f32 to vector<8x128xf32>
    %39 = arith.mulf %37, %38 : vector<8x128xf32>
    %40 = arith.truncf %39 : vector<8x128xf32> to vector<8x128xbf16>
    %c0_10 = arith.constant 0 : index
    %c0_11 = arith.constant 0 : index
    %41 = vector.load %arg5[%c0_10, %c0_11] : memref<128x128xbf16, #tpu.memory_space<vmem>>, vector<128x128xbf16>
    %cst_12 = arith.constant dense<0.000000e+00> : vector<8x128xf32>
    %42 = tpu.matmul %40, %41, %cst_12 {dimension_numbers = #tpu.dot_dimension_numbers<[1], [0], [0], [1], [0, 0, 1, 1], [], []>} : vector<8x128xbf16>, vector<128x128xbf16>, vector<8x128xf32> -> vector<8x128xf32>
    %c0_13 = arith.constant 0 : index
    %c0_14 = arith.constant 0 : index
    %43 = vector.load %arg6[%c0_13, %c0_14] : memref<1x128xf32, #tpu.memory_space<vmem>>, vector<1x128xf32>
    %44 = vector.broadcast %43 : vector<1x128xf32> to vector<8x128xf32>
    %45 = arith.addf %42, %44 : vector<8x128xf32>
    %c0_15 = arith.constant 0 : index
    %c0_16 = arith.constant 0 : index
    %46 = vector.load %arg7[%c0_15, %c0_16] : memref<8x128xf32, #tpu.memory_space<vmem>>, vector<8x128xf32>
    tpu.vector_store %arg7[%c0_15, %c0_16], %45 {strides = array<i32>} : memref<8x128xf32, #tpu.memory_space<vmem>>, vector<8x128xf32>,
    return
  }
  func.func @transform_0(%arg0: i32, %arg1: memref<1xi32, #tpu.memory_space<smem>>) -> (i32, i32) {
    %c0_i32 = arith.constant 0 : i32
    %c0_i32_0 = arith.constant 0 : i32
    return %arg0, %c0_i32 : i32, i32
  }
  func.func @transform_1(%arg0: i32, %arg1: memref<1xi32, #tpu.memory_space<smem>>) -> (i32, i32) {
    %c0_i32 = arith.constant 0 : i32
    %c0_i32_0 = arith.constant 0 : i32
    %c0_i32_1 = arith.constant 0 : i32
    return %c0_i32, %c0_i32_0 : i32, i32
  }
  func.func @transform_2(%arg0: i32, %arg1: memref<1xi32, #tpu.memory_space<smem>>) -> (i32, i32) {
    %c0_i32 = arith.constant 0 : i32
    %c0_i32_0 = arith.constant 0 : i32
    %c0_i32_1 = arith.constant 0 : i32
    return %c0_i32, %c0_i32_0 : i32, i32
  }
  func.func @transform_3(%arg0: i32, %arg1: memref<1xi32, #tpu.memory_space<smem>>) -> (i32, i32) {
    %c0_i32 = arith.constant 0 : i32
    %c0_i32_0 = arith.constant 0 : i32
    %c0_i32_1 = arith.constant 0 : i32
    return %c0_i32, %c0_i32_0 : i32, i32
  }
  func.func @transform_4(%arg0: i32, %arg1: memref<1xi32, #tpu.memory_space<smem>>) -> (i32, i32) {
    %c0_i32 = arith.constant 0 : i32
    %c0_i32_0 = arith.constant 0 : i32
    %c0_i32_1 = arith.constant 0 : i32
    return %c0_i32, %c0_i32_0 : i32, i32
  }
  func.func @transform_5(%arg0: i32, %arg1: memref<1xi32, #tpu.memory_space<smem>>) -> (i32, i32) {
    %c0_i32 = arith.constant 0 : i32
    %c0_i32_0 = arith.constant 0 : i32
    return %arg0, %c0_i32 : i32, i32
  }
}

</mosaic_0001>

<bundles_post_ra>
// kernel: tpu_custom_call.1
= control target key start
LH: loop header
LB: loop body
LE: loop exit
PB: predicated region body
PF: predicated region fallthrough
CT: control target
= control target key end

     0   :  { %12 = vsyncpa [#allocation5], 0  ;;  %s630_s0 = inlined_call_operand.<no memory space> [shape: s32[1], index: 0, kind: input, shape index: {}]   ;;  %s631_s1 = inlined_call_operand.hbm [shape: f32[8,128], index: 1, kind: input, shape index: {}]   ;;  %s632_s2 = inlined_call_operand.hbm [shape: bf16[128,128], index: 2, kind: input, shape index: {}]   ;;  %s633_s3 = inlined_call_operand.vmem [shape: f32[1,128], index: 3, kind: input, shape index: {}]   ;;  %s634_s4 = inlined_call_operand.hbm [shape: bf16[128,128], index: 4, kind: input, shape index: {}]   ;;  %s635_s5 = inlined_call_operand.vmem [shape: f32[1,128], index: 5, kind: input, shape index: {}]   ;;  %s636_s6 = inlined_call_operand.hbm [shape: f32[8,128], index: 6, kind: output, shape index: {}]  }
   0x1   :  { %13 = vsyncpa [#allocation8], 0 }
   0x2   :  { %14 = vsyncpa [#allocation6], 0  ;;  %s524_s21 = smov [#allocation7]   ;;  %s430_s25 = scalar_lea.hbm %s632_s2, 1024 }
   0x3   :  { %s30_s22 = sshll.u32 %s524_s21, 4  ;;  %p431_p0 = scmp.ne.s32.totalorder %s632_s2, %s430_s25  ;;  %s31_s22 = int_to_ptr.vmem [resolvable:$true] %s30_s22 }
   0x4   :  { %p434_p1 = scmp.lt.u32.totalorder %s430_s25, %s632_s2 }
   0x6   :  { %p436_p2 = pnand %p434_p1, %p431_p0 }
   0x8   :  { %439 = shalt.err (!%p436_p2)
}
   0x9   :  { %s440_s30 = scalar_lea.vmem %s31_s22, 1024  ;;  %p445_p4 = scmp.lt.s32.totalorder %s31_s22, %s31_s22 }
   0xa   :  { %p441_p3 = scmp.ne.s32.totalorder %s31_s22, %s440_s30  ;;  %p446_p5 = scmp.lt.s32.totalorder %s440_s30, %s440_s30 }
   0xc   :  { %p447_p6 = por %p446_p5, %p445_p4 }
   0xe   :  { %p448_p7 = pnand %p447_p6, %p441_p3 }
  0x10   :  { %451 = shalt.err (!%p448_p7)
}
  0x11   :  { %s525_s7 = smov 64   ;;  %s526_s8 = smov 4  }
  0x12   :  { %36 = dma.hbm_to_vmem [thread:$0]  %s632_s2, 1024, %s31_s22, [#allocation8], %s525_s7, %s525_s7, %s526_s8  }
  0x13   :  { %s527_s11 = smov [#allocation4]   ;;  %s528_s13 = smov [#allocation9]  }
  0x14   :  { %s21_s12 = sshll.u32 %s527_s11, 4  ;;  %s44_s14 = sshll.u32 %s528_s13, 4  ;;  %s22_s12 = int_to_ptr.vmem [resolvable:$true] %s21_s12  ;;  %s45_s14 = int_to_ptr.vmem [resolvable:$true] %s44_s14 }
  0x15   :  { %s452_s17 = scalar_lea.hbm %s631_s1, 128 }
  0x16   :  { %p453_p8 = scmp.ne.s32.totalorder %s631_s1, %s452_s17  ;;  %p456_p9 = scmp.lt.u32.totalorder %s452_s17, %s631_s1 }
  0x18   :  { %p458_p10 = pnand %p456_p9, %p453_p8 }
  0x1a   :  { %461 = shalt.err (!%p458_p10)
}
  0x1b   :  { %s462_s2 = scalar_lea.vmem %s22_s12, 128  ;;  %p467_p12 = scmp.lt.s32.totalorder %s22_s12, %s22_s12 }
  0x1c   :  { %p463_p11 = scmp.ne.s32.totalorder %s22_s12, %s462_s2  ;;  %p468_p13 = scmp.lt.s32.totalorder %s462_s2, %s462_s2 }
  0x1e   :  { %p469_p0 = por %p468_p13, %p467_p12 }
  0x20   :  { %p470_p1 = pnand %p469_p0, %p463_p11 }
  0x22   :  { %473 = shalt.err (!%p470_p1)
}
  0x23   :  { %24 = dma.hbm_to_vmem [thread:$0]  %s631_s1, 128, %s22_s12, [#allocation5]  }
  0x24   :  { %s474_s26 = scalar_lea.hbm %s634_s4, 1024 }
  0x25   :  { %p475_p2 = scmp.ne.s32.totalorder %s634_s4, %s474_s26  ;;  %p478_p3 = scmp.lt.u32.totalorder %s474_s26, %s634_s4 }
  0x27   :  { %p480_p4 = pnand %p478_p3, %p475_p2 }
  0x29   :  { %483 = shalt.err (!%p480_p4)
}
  0x2a   :  { %s484_s9 = scalar_lea.vmem %s45_s14, 1024  ;;  %p489_p6 = scmp.lt.s32.totalorder %s45_s14, %s45_s14 }
  0x2b   :  { %p485_p5 = scmp.ne.s32.totalorder %s45_s14, %s484_s9  ;;  %p490_p7 = scmp.lt.s32.totalorder %s484_s9, %s484_s9 }
  0x2d   :  { %p491_p8 = por %p490_p7, %p489_p6 }
  0x2f   :  { %p492_p9 = pnand %p491_p8, %p485_p5 }
  0x31   :  { %495 = shalt.err (!%p492_p9)
}
  0x32   :  { %50 = dma.hbm_to_vmem [thread:$0]  %s634_s4, 1024, %s45_s14, [#allocation8], %s525_s7, %s525_s7, %s526_s8  }
  0x33   :  { %518 = dma.done.wait [#allocation5], 128  }
  0x34   :  { %519 = vsyncadd [#allocation5], 4294967168 }
  0x35   :  { %520 = dma.done.wait [#allocation8], 2048  }
  0x36   :  { %521 = vsyncadd [#allocation8], 4294965248  ;;  %v529_v0 = vmov 0.0   ;;  %vm530_vm0 = vmmov 0   ;;  %v414_v1 = vld [vmem:[#allocation7] sm:$0xff]   ;;  %v415_v2 = vld [vmem:[#allocation7 + $0x8] sm:$0xff]   ;;  %v177_v19 = vlaneseq }
  0x37   :  { %366 = vmatprep.subr.bf16.mxu0 %v529_v0  ;;  %382 = vmatprep.mubr.msk.bf16.mxu0 %vm530_vm0, %v529_v0  ;;  %v416_v3 = vld [vmem:[#allocation7 + $0x10] sm:$0xff]   ;;  %v422_v4 = vld [vmem:[#allocation9] sm:$0xff]   ;;  %v417_v5 = vld [vmem:[#allocation7 + $0x18] sm:$0xff]   ;;  %s187_s8 = smul.u32 2654435769, %s630_s0  ;;  %s531_s14 = smov [#allocation10]  }
  0x38   :  { %386 = vmatprep.subr.bf16.mxu1 %v529_v0  ;;  %402 = vmatprep.mubr.msk.bf16.mxu1 %vm530_vm0, %v529_v0  ;;  %v423_v6 = vld [vmem:[#allocation9 + $0x8] sm:$0xff]   ;;  %v418_v7 = vld [vmem:[#allocation7 + $0x20] sm:$0xff]   ;;  %v424_v8 = vld [vmem:[#allocation9 + $0x10] sm:$0xff]   ;;  %v178_v20 = vshrl.u32 %v177_v19, 7  ;;  %v180_v21 = vand.u32 127, %v177_v19  ;;  %s320_s15 = sshll.u32 %s531_s14, 4  ;;  %s321_s15 = int_to_ptr.vmem [resolvable:$true] %s320_s15 }
  0x39   :  { %367 = vmatpush3.bf16.msra.mxu0 %v414_v1  ;;  %387 = vmatpush3.bf16.msra.mxu1 %v422_v4  ;;  %v419_v9 = vld [vmem:[#allocation7 + $0x28] sm:$0xff]   ;;  %v425_v10 = vld [vmem:[#allocation9 + $0x18] sm:$0xff]   ;;  %v420_v11 = vld [vmem:[#allocation7 + $0x30] sm:$0xff]   ;;  %v188_v24 = vstv %s187_s8  ;;  %p501_p11 = scmp.lt.s32.totalorder %s321_s15, %s321_s15 }
  0x3a   :  { %368 = vmatprep.subr.bf16.mxu0 %v529_v0  ;;  %388 = vmatprep.subr.bf16.mxu1 %v529_v0  ;;  %v426_v12 = vld [vmem:[#allocation9 + $0x20] sm:$0xff]   ;;  %v421_v13 = vld [vmem:[#allocation7 + $0x38] sm:$0xff]   ;;  %v427_v15 = vld [vmem:[#allocation9 + $0x28] sm:$0xff]   ;;  %v184_v22 = vmul.u32 128, %v178_v20 }
  0x3b   :  { %v63_v14 = vld [vmem:[#allocation4] sm:$0xff]  ;;  %v428_v17 = vld [vmem:[#allocation9 + $0x30] sm:$0xff]  }
  0x3c   :  { %v64_v16 = vpack.c.bf16 %v63_v14, %v63_v14  ;;  %v429_v18 = vld [vmem:[#allocation9 + $0x38] sm:$0xff]   ;;  %v185_v23 = vadd.s32 %v184_v22, %v180_v21 }
  0x3d   :  { %369 = vmatpush3.bf16.msra.mxu0 %v415_v2  ;;  %389 = vmatpush3.bf16.msra.mxu1 %v423_v6  ;;  %v330_v33 = vld [vmem:[%s633_s3] ss:$0 sm:$0xff]  ;;  %s496_s3 = scalar_lea.vmem %s321_s15, 128 }
  0x3e   :  { %370 = vmatprep.subr.bf16.mxu0 %v529_v0  ;;  %390 = vmatprep.subr.bf16.mxu1 %v529_v0  ;;  %v189_v25 = vxor.u32 %v188_v24, %v185_v23  ;;  %v339_v44 = vld [vmem:[%s635_s5] ss:$0 sm:$0xff]  ;;  %p497_p10 = scmp.ne.s32.totalorder %s321_s15, %s496_s3  ;;  %p502_p12 = scmp.lt.s32.totalorder %s496_s3, %s496_s3 }
  0x40   :  { %v190_v26 = vshrl.u32 %v189_v25, 16  ;;  %p503_p13 = por %p502_p12, %p501_p11 }
  0x41   :  { %371 = vmatpush3.bf16.msra.mxu0 %v416_v3  ;;  %391 = vmatpush3.bf16.msra.mxu1 %v424_v8 }
  0x42   :  { %372 = vmatprep.subr.bf16.mxu0 %v529_v0  ;;  %392 = vmatprep.subr.bf16.mxu1 %v529_v0  ;;  %v191_v27 = vxor.u32 %v190_v26, %v189_v25  ;;  %p504_p0 = pnand %p503_p13, %p497_p10 }
  0x44   :  { %v192_v28 = vmul.u32 2146121005, %v191_v27 }
  0x45   :  { %373 = vmatpush3.bf16.msra.mxu0 %v417_v5  ;;  %393 = vmatpush3.bf16.msra.mxu1 %v425_v10 }
  0x46   :  { %374 = vmatprep.subr.bf16.mxu0 %v529_v0  ;;  %394 = vmatprep.subr.bf16.mxu1 %v529_v0  ;;  %v193_v29 = vshrl.u32 %v192_v28, 15 }
  0x48   :  { %v194_v30 = vxor.u32 %v193_v29, %v192_v28 }
  0x49   :  { %375 = vmatpush3.bf16.msra.mxu0 %v418_v7  ;;  %395 = vmatpush3.bf16.msra.mxu1 %v426_v12 }
  0x4a   :  { %376 = vmatprep.subr.bf16.mxu0 %v529_v0  ;;  %396 = vmatprep.subr.bf16.mxu1 %v529_v0  ;;  %v195_v31 = vmul.u32 2221713035, %v194_v30 }
  0x4c   :  { %v196_v32 = vshrl.u32 %v195_v31, 16 }
  0x4d   :  { %377 = vmatpush3.bf16.msra.mxu0 %v419_v9  ;;  %397 = vmatpush3.bf16.msra.mxu1 %v427_v15 }
  0x4e   :  { %378 = vmatprep.subr.bf16.mxu0 %v529_v0  ;;  %398 = vmatprep.subr.bf16.mxu1 %v529_v0  ;;  %v197_v34 = vxor.u32 %v196_v32, %v195_v31 }
  0x50   :  { %vm198_vm1 = vcmp.ge.u32.totalorder %v197_v34, 2147483648 }
  0x51   :  { %379 = vmatpush3.bf16.msra.mxu0 %v420_v11  ;;  %399 = vmatpush3.bf16.msra.mxu1 %v428_v17 }
  0x52   :  { %380 = vmatprep.subr.bf16.mxu0 %v529_v0  ;;  %400 = vmatprep.subr.bf16.mxu1 %v529_v0 }
  0x55   :  { %381 = vmatpush3.bf16.msra.mxu0 %v421_v13  ;;  %401 = vmatpush3.bf16.msra.mxu1 %v429_v18 }
  0x58   :  { %383 = vmatmul.mubr.bf16.vlgmr.msra.gmra.mrb[0].mxu0 %v64_v16 }
 0x12b   :  { %v170_v35 = vpop.f32.mrb[0].mxu0 }
 0x12c   :  { %v171_v36 = vadd.f32 %v330_v33, %v170_v35  ;;  %v384_v37 = vpop.f32.mrb[1].mxu0 }
 0x12d   :  { %v173_v38 = vpop.f32.mrb[2].mxu0 }
 0x12e   :  { %v176_v39 = vmax.f32 %v171_v36, 0.0  ;;  %v385_v40 = vpop.f32.mrb[3].mxu0 }
 0x130   :  { %v199_v41 = vsel %vm198_vm1, %v176_v39, 0.0 }
 0x131   :  { %v200_v42 = vmul.f32 2.0, %v199_v41 }
 0x133   :  { %v201_v43 = vpack.c.bf16 %v200_v42, %v200_v42 }
 0x135   :  { %403 = vmatmul.mubr.bf16.vlgmr.msra.gmra.mrb[0].mxu1 %v201_v43 }
 0x208   :  { %v307_v45 = vpop.f32.mrb[0].mxu1 }
 0x209   :  { %v308_v46 = vadd.f32 %v339_v44, %v307_v45  ;;  %v404_v47 = vpop.f32.mrb[1].mxu1 }
 0x20a   :  { %v310_v48 = vpop.f32.mrb[2].mxu1 }
 0x20b   :  { %313 = vst [vmem:[#allocation10] sm:$0xff] %v308_v46  ;;  %v405_v49 = vpop.f32.mrb[3].mxu1 }
 0x20c   :  { %507 = shalt.err (!%p504_p0)
}
 0x20d   :  { %s508_s5 = scalar_lea.hbm %s636_s6, 128 }
 0x20e   :  { %p509_p1 = scmp.ne.s32.totalorder %s636_s6, %s508_s5  ;;  %p512_p2 = scmp.lt.u32.totalorder %s508_s5, %s636_s6 }
 0x210   :  { %p514_p3 = pnand %p512_p2, %p509_p1 }
 0x212   :  { %517 = shalt.err (!%p514_p3)
}
 0x213   :  { %323 = dma.vmem_to_hbm [thread:$0]  %s321_s15, 128, %s636_s6, [#allocation6]  }
 0x214   :  { %522 = dma.done.wait [#allocation6], 128  }
 0x215   :  { %523 = vsyncadd [#allocation6], 4294967168 }
 0x216   :  { %327 = vsyncpa [#allocation5], 1 }
 0x217   :  { %328 = vsyncpa [#allocation8], 1 }
 0x218   :  { %329 = vsyncpa [#allocation6], 1 }

</bundles_post_ra>
